<compile_context>
chip_gen: v6e
topology: v6e:2x2x1
jax: 0.10.0
libtpu: 0.0.40
codegen_flags: <defaults>
</compile_context>

<pallas_src>
import jax
import jax.numpy as jnp
from jax import lax
from jax.experimental import pallas as pl
from jax.experimental.pallas import tpu as pltpu


def _mlp_kernel(x_ref, w1_ref, b1_ref, w2_ref, b2_ref, o_ref):
    # x_ref / o_ref: (tile_rows, 128) f32 blocks of the flat, feature-
    # interleaved activation stream [x0(b0), x1(b0), x0(b1), x1(b1), ...].
    # w*_ref / b*_ref: SMEM scalars in PyTorch Linear (out, in) layout.
    v = x_ref[...]

    # Lane parity: even lanes carry input feature 0, odd lanes feature 1.
    lane = lax.broadcasted_iota(jnp.int32, v.shape, 1)
    is_f0 = (lane & 1) == 0

    # Partner feature of each lane via cyclic lane rotations (XLU slot).
    # jnp.roll semantics: roll(v, s)[i] == v[i - s].
    nxt = pltpu.roll(v, shift=127, axis=1)   # nxt[i] = v[i + 1]
    prv = pltpu.roll(v, shift=1, axis=1)     # prv[i] = v[i - 1]
    x0 = jnp.where(is_f0, v, prv)            # feature 0 of this lane's batch row
    x1 = jnp.where(is_f0, nxt, v)            # feature 1 of this lane's batch row

    def sigmoid(z):
        # EUP-friendly: tanh has its own VLIW slot, keeps the VALU free.
        return 0.5 * jnp.tanh(0.5 * z) + 0.5

    # Hidden layer: h_j = sigmoid(W1[j,0]*x0 + W1[j,1]*x1 + b1[j])
    h0 = sigmoid(w1_ref[0, 0] * x0 + w1_ref[0, 1] * x1 + b1_ref[0])
    h1 = sigmoid(w1_ref[1, 0] * x0 + w1_ref[1, 1] * x1 + b1_ref[1])

    # Output layer, produced directly in the same interleaved layout: even
    # lanes need output feature 0, odd lanes feature 1, so pick the weight
    # row per lane instead of computing both outputs and selecting after.
    w_a = jnp.where(is_f0, w2_ref[0, 0], w2_ref[1, 0])
    w_b = jnp.where(is_f0, w2_ref[0, 1], w2_ref[1, 1])
    b_o = jnp.where(is_f0, b2_ref[0], b2_ref[1])
    o_ref[...] = sigmoid(w_a * h0 + w_b * h1 + b_o).astype(o_ref.dtype)


def _round_up(n, m):
    return ((n + m - 1) // m) * m


def reference_forward(x, w1, b1, w2, b2):
    h = jax.nn.sigmoid(x @ w1.T + b1)
    return jax.nn.sigmoid(h @ w2.T + b2)


def _mlp_forward_pallas(x, w1, b1, w2, b2, *, max_block_rows):
    B = x.shape[0]
    n = 2 * B                                  # flat element count, interleaved

    # Sublane-packed layout: flat stream viewed as (rows, 128), rows % 8 == 0.
    rows_needed = pl.cdiv(n, 128)
    rows_aligned = _round_up(max(rows_needed, 1), 8)
    max_rows = max(8, _round_up(max_block_rows, 8))

    steps = pl.cdiv(rows_aligned, max_rows)
    if steps == 1 and rows_aligned >= 16:
        steps = 2                              # give v7x's 2nd TensorCore work
    tile_rows = _round_up(pl.cdiv(rows_aligned, steps), 8)
    total_rows = tile_rows * steps
    n_pad = total_rows * 128

    x_flat = x.reshape(-1).astype(jnp.float32)
    if n_pad != n:
        x_flat = jnp.pad(x_flat, (0, n_pad - n))   # pad only to the block grain
    x_blocks = x_flat.reshape(total_rows, 128)

    smem = pl.BlockSpec(memory_space=pltpu.MemorySpace.SMEM)

    out_blocks = pl.pallas_call(
        _mlp_kernel,
        out_shape=jax.ShapeDtypeStruct((total_rows, 128), jnp.float32),
        grid=(steps,),
        in_specs=[
            pl.BlockSpec((tile_rows, 128), lambda i: (i, 0)),  # activations
            smem,  # w1
            smem,  # b1
            smem,  # w2
            smem,  # b2
        ],
        out_specs=pl.BlockSpec((tile_rows, 128), lambda i: (i, 0)),
        compiler_params=pltpu.CompilerParams(
            dimension_semantics=("parallel",),    # shards steps across TCs
            vmem_limit_bytes=32 * 1024 * 1024,    # ample; blocks are <= 1 MiB
        ),
    )(
        x_blocks,
        w1.astype(jnp.float32),
        b1.astype(jnp.float32),
        w2.astype(jnp.float32),
        b2.astype(jnp.float32),
    )

    # Drop padding; output is already in the natural (B, 2) interleave.
    return out_blocks.reshape(-1)[:n].reshape(B, 2)


def mlp_forward(x, w1, b1, w2, b2, *, max_block_rows=2048,
                min_pallas_batch=2048, force_pallas=False):
    """Forward pass of the 2->2->2 sigmoid MLP.

    x: (B, 2); w1, w2: (2, 2) PyTorch (out, in) layout; b1, b2: (2,).
    Returns (B, 2) f32 == sigmoid(sigmoid(x @ w1.T + b1) @ w2.T + b2).
    """
    assert x.ndim == 2 and x.shape[1] == 2, "expected (B, 2) input"
    assert w1.shape == (2, 2) and w2.shape == (2, 2), "kernel hard-codes 2x2 layers"
    assert b1.shape == (2,) and b2.shape == (2,), "kernel hard-codes 2-wide biases"

    if not force_pallas and x.shape[0] < min_pallas_batch:
        # Tiny batches: pallas_call launch + padding overhead dominates and
        # XLA fuses this 2x2 MLP into one elementwise kernel anyway.
        return reference_forward(x.astype(jnp.float32), w1.astype(jnp.float32),
                                 b1.astype(jnp.float32), w2.astype(jnp.float32),
                                 b2.astype(jnp.float32))
    return _mlp_forward_pallas(x, w1, b1, w2, b2, max_block_rows=max_block_rows)


if __name__ == "__main__":
    key = jax.random.PRNGKey(0)
    kx, k1, k2, k3, k4, kx2 = jax.random.split(key, 6)

    in_features = hidden = out_features = 2

    # Deterministic init mimicking nn.Linear's uniform(-1/sqrt(in), 1/sqrt(in)).
    bound = 1.0 / jnp.sqrt(in_features)
    w1 = jax.random.uniform(k1, (hidden, in_features), jnp.float32, -bound, bound)
    b1 = jax.random.uniform(k2, (hidden,), jnp.float32, -bound, bound)
    bound2 = 1.0 / jnp.sqrt(hidden)
    w2 = jax.random.uniform(k3, (out_features, hidden), jnp.float32, -bound2, bound2)
    b2 = jax.random.uniform(k4, (out_features,), jnp.float32, -bound2, bound2)

    # Small batch: single grid step, forced through the Pallas path.
    B = 8
    x = jax.random.normal(kx, (B, in_features), dtype=jnp.float32)
    out = jax.block_until_ready(mlp_forward(x, w1, b1, w2, b2, force_pallas=True))
    ref = reference_forward(x, w1, b1, w2, b2)
    assert out.shape == (B, out_features)
    assert jnp.allclose(out, ref, atol=2e-5, rtol=2e-5), "mismatch vs reference (B=8)"

    # Larger ragged batch: exercises padding to the block grain and a
    # multi-step "parallel" grid (several (16,128) tiles).
    B2 = 4500
    x2 = jax.random.normal(kx2, (B2, in_features), dtype=jnp.float32)
    out2 = jax.block_until_ready(
        mlp_forward(x2, w1, b1, w2, b2, max_block_rows=16, force_pallas=True))
    ref2 = reference_forward(x2, w1, b1, w2, b2)
    assert out2.shape == (B2, out_features)
    assert jnp.allclose(out2, ref2, atol=2e-5, rtol=2e-5), "mismatch vs reference (B=4500)"

    print("KERNEL_OK")
</pallas_src>

<mosaic_0001>
module attributes {stable_mosaic.version = 11 : i64} {
  func.func @_mlp_kernel(%arg0: i32, %arg1: memref<8x128xf32, #tpu.memory_space<vmem>>, %arg2: memref<2x2xf32, #tpu.memory_space<smem>>, %arg3: memref<2xf32, #tpu.memory_space<smem>>, %arg4: memref<2x2xf32, #tpu.memory_space<smem>>, %arg5: memref<2xf32, #tpu.memory_space<smem>>, %arg6: memref<8x128xf32, #tpu.memory_space<vmem>>) attributes {dimension_semantics = [#tpu.dimension_semantics<parallel>], iteration_bounds = array<i64: 1>, scalar_prefetch = 0 : i64, scratch_operands = 0 : i64, tpu.core_type = #tpu.core_type<tc>, window_params = [{transform_indices = @transform_0, window_bounds = array<i64: 8, 128>}, {transform_indices = @transform_1, window_bounds = array<i64: 2, 2>}, {transform_indices = @transform_2, window_bounds = array<i64: 2>}, {transform_indices = @transform_3, window_bounds = array<i64: 2, 2>}, {transform_indices = @transform_4, window_bounds = array<i64: 2>}, {transform_indices = @transform_5, window_bounds = array<i64: 8, 128>}]} {
    %c0 = arith.constant 0 : index
    %c0_0 = arith.constant 0 : index
    %0 = vector.load %arg1[%c0, %c0_0] : memref<8x128xf32, #tpu.memory_space<vmem>>, vector<8x128xf32>
    %1 = tpu.iota {dimensions = array<i32: 1>} : vector<8x128xi32>
    %c1_i32 = arith.constant 1 : i32
    %2 = vector.broadcast %c1_i32 : i32 to vector<8x128xi32>
    %3 = arith.andi %1, %2 : vector<8x128xi32>
    %c0_i32 = arith.constant 0 : i32
    %4 = vector.broadcast %c0_i32 : i32 to vector<8x128xi32>
    %5 = arith.cmpi eq, %3, %4 : vector<8x128xi32>
    %c127_i32 = arith.constant 127 : i32
    %6 = tpu.dynamic_rotate %0 by %c127_i32 dim 1 : vector<8x128xf32>, i32 -> vector<8x128xf32>
    %c1_i32_1 = arith.constant 1 : i32
    %7 = tpu.dynamic_rotate %0 by %c1_i32_1 dim 1 : vector<8x128xf32>, i32 -> vector<8x128xf32>
    %8 = arith.select %5, %0, %7 : vector<8x128xi1>, vector<8x128xf32>
    %9 = arith.select %5, %6, %0 : vector<8x128xi1>, vector<8x128xf32>
    %c0_2 = arith.constant 0 : index
    %c0_3 = arith.constant 0 : index
    %10 = memref.load %arg2[%c0_2, %c0_3] : memref<2x2xf32, #tpu.memory_space<smem>>
    %11 = vector.broadcast %10 : f32 to vector<8x128xf32>
    %12 = arith.mulf %11, %8 : vector<8x128xf32>
    %c0_4 = arith.constant 0 : index
    %c1 = arith.constant 1 : index
    %13 = memref.load %arg2[%c0_4, %c1] : memref<2x2xf32, #tpu.memory_space<smem>>
    %14 = vector.broadcast %13 : f32 to vector<8x128xf32>
    %15 = arith.mulf %14, %9 : vector<8x128xf32>
    %16 = arith.addf %12, %15 : vector<8x128xf32>
    %c0_5 = arith.constant 0 : index
    %17 = memref.load %arg3[%c0_5] : memref<2xf32, #tpu.memory_space<smem>>
    %18 = vector.broadcast %17 : f32 to vector<8x128xf32>
    %19 = arith.addf %16, %18 : vector<8x128xf32>
    %cst = arith.constant 5.000000e-01 : f32
    %20 = vector.broadcast %cst : f32 to vector<8x128xf32>
    %21 = arith.mulf %20, %19 : vector<8x128xf32>
    %22 = math.tanh %21 : vector<8x128xf32>
    %cst_6 = arith.constant 5.000000e-01 : f32
    %23 = vector.broadcast %cst_6 : f32 to vector<8x128xf32>
    %24 = arith.mulf %23, %22 : vector<8x128xf32>
    %cst_7 = arith.constant 5.000000e-01 : f32
    %25 = vector.broadcast %cst_7 : f32 to vector<8x128xf32>
    %26 = arith.addf %24, %25 : vector<8x128xf32>
    %c1_8 = arith.constant 1 : index
    %c0_9 = arith.constant 0 : index
    %27 = memref.load %arg2[%c1_8, %c0_9] : memref<2x2xf32, #tpu.memory_space<smem>>
    %28 = vector.broadcast %27 : f32 to vector<8x128xf32>
    %29 = arith.mulf %28, %8 : vector<8x128xf32>
    %c1_10 = arith.constant 1 : index
    %c1_11 = arith.constant 1 : index
    %30 = memref.load %arg2[%c1_10, %c1_11] : memref<2x2xf32, #tpu.memory_space<smem>>
    %31 = vector.broadcast %30 : f32 to vector<8x128xf32>
    %32 = arith.mulf %31, %9 : vector<8x128xf32>
    %33 = arith.addf %29, %32 : vector<8x128xf32>
    %c1_12 = arith.constant 1 : index
    %34 = memref.load %arg3[%c1_12] : memref<2xf32, #tpu.memory_space<smem>>
    %35 = vector.broadcast %34 : f32 to vector<8x128xf32>
    %36 = arith.addf %33, %35 : vector<8x128xf32>
    %cst_13 = arith.constant 5.000000e-01 : f32
    %37 = vector.broadcast %cst_13 : f32 to vector<8x128xf32>
    %38 = arith.mulf %37, %36 : vector<8x128xf32>
    %39 = math.tanh %38 : vector<8x128xf32>
    %cst_14 = arith.constant 5.000000e-01 : f32
    %40 = vector.broadcast %cst_14 : f32 to vector<8x128xf32>
    %41 = arith.mulf %40, %39 : vector<8x128xf32>
    %cst_15 = arith.constant 5.000000e-01 : f32
    %42 = vector.broadcast %cst_15 : f32 to vector<8x128xf32>
    %43 = arith.addf %41, %42 : vector<8x128xf32>
    %c0_16 = arith.constant 0 : index
    %c0_17 = arith.constant 0 : index
    %44 = memref.load %arg4[%c0_16, %c0_17] : memref<2x2xf32, #tpu.memory_space<smem>>
    %c1_18 = arith.constant 1 : index
    %c0_19 = arith.constant 0 : index
    %45 = memref.load %arg4[%c1_18, %c0_19] : memref<2x2xf32, #tpu.memory_space<smem>>
    %46 = vector.broadcast %44 : f32 to vector<8x128xf32>
    %47 = vector.broadcast %45 : f32 to vector<8x128xf32>
    %48 = arith.select %5, %46, %47 : vector<8x128xi1>, vector<8x128xf32>
    %c0_20 = arith.constant 0 : index
    %c1_21 = arith.constant 1 : index
    %49 = memref.load %arg4[%c0_20, %c1_21] : memref<2x2xf32, #tpu.memory_space<smem>>
    %c1_22 = arith.constant 1 : index
    %c1_23 = arith.constant 1 : index
    %50 = memref.load %arg4[%c1_22, %c1_23] : memref<2x2xf32, #tpu.memory_space<smem>>
    %51 = vector.broadcast %49 : f32 to vector<8x128xf32>
    %52 = vector.broadcast %50 : f32 to vector<8x128xf32>
    %53 = arith.select %5, %51, %52 : vector<8x128xi1>, vector<8x128xf32>
    %c0_24 = arith.constant 0 : index
    %54 = memref.load %arg5[%c0_24] : memref<2xf32, #tpu.memory_space<smem>>
    %c1_25 = arith.constant 1 : index
    %55 = memref.load %arg5[%c1_25] : memref<2xf32, #tpu.memory_space<smem>>
    %56 = vector.broadcast %54 : f32 to vector<8x128xf32>
    %57 = vector.broadcast %55 : f32 to vector<8x128xf32>
    %58 = arith.select %5, %56, %57 : vector<8x128xi1>, vector<8x128xf32>
    %59 = arith.mulf %48, %26 : vector<8x128xf32>
    %60 = arith.mulf %53, %43 : vector<8x128xf32>
    %61 = arith.addf %59, %60 : vector<8x128xf32>
    %62 = arith.addf %61, %58 : vector<8x128xf32>
    %cst_26 = arith.constant 5.000000e-01 : f32
    %63 = vector.broadcast %cst_26 : f32 to vector<8x128xf32>
    %64 = arith.mulf %63, %62 : vector<8x128xf32>
    %65 = math.tanh %64 : vector<8x128xf32>
    %cst_27 = arith.constant 5.000000e-01 : f32
    %66 = vector.broadcast %cst_27 : f32 to vector<8x128xf32>
    %67 = arith.mulf %66, %65 : vector<8x128xf32>
    %cst_28 = arith.constant 5.000000e-01 : f32
    %68 = vector.broadcast %cst_28 : f32 to vector<8x128xf32>
    %69 = arith.addf %67, %68 : vector<8x128xf32>
    %c0_29 = arith.constant 0 : index
    %c0_30 = arith.constant 0 : index
    %70 = vector.load %arg6[%c0_29, %c0_30] : memref<8x128xf32, #tpu.memory_space<vmem>>, vector<8x128xf32>
    tpu.vector_store %arg6[%c0_29, %c0_30], %69 {strides = array<i32>} : memref<8x128xf32, #tpu.memory_space<vmem>>, vector<8x128xf32>,
    return
  }
  func.func @transform_0(%arg0: i32) -> (i32, i32) {
    %c0_i32 = arith.constant 0 : i32
    %c0_i32_0 = arith.constant 0 : i32
    return %arg0, %c0_i32 : i32, i32
  }
  func.func @transform_1(%arg0: i32) -> (i32, i32) {
    %c0_i32 = arith.constant 0 : i32
    %c0_i32_0 = arith.constant 0 : i32
    %c0_i32_1 = arith.constant 0 : i32
    return %c0_i32, %c0_i32_0 : i32, i32
  }
  func.func @transform_2(%arg0: i32) -> i32 {
    %c0_i32 = arith.constant 0 : i32
    %c0_i32_0 = arith.constant 0 : i32
    return %c0_i32 : i32
  }
  func.func @transform_3(%arg0: i32) -> (i32, i32) {
    %c0_i32 = arith.constant 0 : i32
    %c0_i32_0 = arith.constant 0 : i32
    %c0_i32_1 = arith.constant 0 : i32
    return %c0_i32, %c0_i32_0 : i32, i32
  }
  func.func @transform_4(%arg0: i32) -> i32 {
    %c0_i32 = arith.constant 0 : i32
    %c0_i32_0 = arith.constant 0 : i32
    return %c0_i32 : i32
  }
  func.func @transform_5(%arg0: i32) -> (i32, i32) {
    %c0_i32 = arith.constant 0 : i32
    %c0_i32_0 = arith.constant 0 : i32
    return %arg0, %c0_i32 : i32, i32
  }
}

</mosaic_0001>

<bundles_post_ra>
// kernel: tpu_custom_call.1
= control target key start
LH: loop header
LB: loop body
LE: loop exit
PB: predicated region body
PF: predicated region fallthrough
CT: control target
= control target key end

     0   :  { %10 = vsyncpa [#allocation3], 0  ;;  %s346_s0 = inlined_call_operand.hbm [shape: f32[8,128], index: 0, kind: input, shape index: {}]   ;;  %s347_s1 = inlined_call_operand.hbm [shape: f32[2,2], index: 1, kind: input, shape index: {}]   ;;  %s348_s2 = inlined_call_operand.vmem [shape: f32[2], index: 2, kind: input, shape index: {}]   ;;  %s349_s3 = inlined_call_operand.vmem [shape: f32[2,2], index: 3, kind: input, shape index: {}]   ;;  %s350_s4 = inlined_call_operand.vmem [shape: f32[2], index: 4, kind: input, shape index: {}]   ;;  %s351_s5 = inlined_call_operand.hbm [shape: f32[8,128], index: 5, kind: output, shape index: {}]  }
   0x1   :  { %11 = vsyncpa [#allocation5], 0 }
   0x2   :  { %12 = vsyncpa [#allocation6], 0 }
   0x3   :  { %13 = vsyncpa [#allocation10], 0  ;;  %s49_s20 = sshll.u32 %s349_s3, 4  ;;  %s50_s20 = int_to_ptr.vmem [resolvable:$true] %s49_s20 }
   0x4   :  { %14 = vsyncpa [#allocation4], 0  ;;  %s182_s21 = scalar_lea.vmem %s50_s20, 32  ;;  %p187_p1 = scmp.lt.s32.totalorder %s50_s20, %s50_s20 }
   0x5   :  { %p183_p0 = scmp.ne.s32.totalorder %s50_s20, %s182_s21  ;;  %p188_p2 = scmp.lt.s32.totalorder %s182_s21, %s182_s21 }
   0x7   :  { %p189_p3 = por %p188_p2, %p187_p1 }
   0x9   :  { %p190_p4 = pnand %p189_p3, %p183_p0 }
   0xb   :  { %193 = shalt.err (!%p190_p4)
}
   0xc   :  { %s276_s22 = smov [#allocation9]   ;;  %s277_s23 = smov [#allocation2]  }
   0xd   :  { %52 = dma.vmem_to_smem %s50_s20, 32, %s276_s22, [#allocation10]  }
   0xe   :  { %s21_s24 = sshll.u32 %s277_s23, 4  ;;  %s39_s27 = sshll.u32 %s348_s2, 4  ;;  %s22_s24 = int_to_ptr.vmem [resolvable:$true] %s21_s24  ;;  %s40_s27 = int_to_ptr.vmem [resolvable:$true] %s39_s27 }
   0xf   :  { %s202_s28 = scalar_lea.vmem %s22_s24, 128  ;;  %p207_p6 = scmp.lt.s32.totalorder %s22_s24, %s22_s24 }
  0x10   :  { %p203_p5 = scmp.ne.s32.totalorder %s22_s24, %s202_s28  ;;  %p208_p7 = scmp.lt.s32.totalorder %s202_s28, %s202_s28 }
  0x12   :  { %p209_p8 = por %p208_p7, %p207_p6 }
  0x14   :  { %p210_p9 = pnand %p209_p8, %p203_p5 }
  0x16   :  { %213 = shalt.err (!%p210_p9)
}
  0x17   :  { %24 = dma.hbm_to_vmem [thread:$0]  %s346_s0, 128, %s22_s24, [#allocation3]  }
  0x18   :  { %s278_s30 = smov [#allocation7]   ;;  %s222_s8 = scalar_lea.vmem %s40_s27, 16 }
  0x19   :  { %32 = dma.hbm_to_smem %s347_s1, 32, %s278_s30, [#allocation5]  }
  0x1a   :  { %p223_p10 = scmp.ne.s32.totalorder %s40_s27, %s222_s8  ;;  %p227_p11 = scmp.lt.s32.totalorder %s40_s27, %s40_s27 }
  0x1b   :  { %p228_p12 = scmp.lt.s32.totalorder %s222_s8, %s222_s8 }
  0x1d   :  { %p229_p13 = por %p228_p12, %p227_p11 }
  0x1f   :  { %p230_p0 = pnand %p229_p13, %p223_p10 }
  0x21   :  { %233 = shalt.err (!%p230_p0)
}
  0x22   :  { %s279_s2 = smov [#allocation8]   ;;  %s59_s11 = sshll.u32 %s350_s4, 4  ;;  %s60_s11 = int_to_ptr.vmem [resolvable:$true] %s59_s11 }
  0x23   :  { %42 = dma.vmem_to_smem %s40_s27, 16, %s279_s2, [#allocation6]  }
  0x24   :  { %s234_s0 = scalar_lea.vmem %s60_s11, 16  ;;  %p239_p2 = scmp.lt.s32.totalorder %s60_s11, %s60_s11 }
  0x25   :  { %p235_p1 = scmp.ne.s32.totalorder %s60_s11, %s234_s0  ;;  %p240_p3 = scmp.lt.s32.totalorder %s234_s0, %s234_s0 }
  0x27   :  { %p241_p4 = por %p240_p3, %p239_p2 }
  0x29   :  { %p242_p5 = pnand %p241_p4, %p235_p1 }
  0x2b   :  { %245 = shalt.err (!%p242_p5)
}
  0x2c   :  { %s280_s1 = smov [#allocation11]  }
  0x2d   :  { %62 = dma.vmem_to_smem %s60_s11, 16, %s280_s1, [#allocation10]  }
  0x2e   :  { %266 = dma.done.wait [#allocation3], 128  }
  0x2f   :  { %267 = vsyncadd [#allocation3], 4294967168 }
  0x30   :  { %268 = dma.done.wait [#allocation5], 32  }
  0x31   :  { %269 = vsyncadd [#allocation5], 4294967264 }
  0x32   :  { %270 = dma.done.wait [#allocation6], 16  }
  0x33   :  { %271 = vsyncadd [#allocation6], 4294967280 }
  0x34   :  { %272 = dma.done.wait [#allocation10], 48  }
  0x35   :  { %273 = vsyncadd [#allocation10], 4294967248 }
  0x36   :  { %78 = sfence }
  0x37   :  { %v79_v0 = vld [vmem:[#allocation2] sm:$0xff]  ;;  %s281_s4 = smov 127   ;;  %s282_s12 = smov 1   ;;  %v80_v1 = vlaneseq }
  0x38   :  { %84 = vrot.lane.b32.xlu0 %v79_v0, %s281_s4  ;;  %s160_s13 = sld [smem:[#allocation7 + $0x1]]  ;;  %s283_s25 = smov [#allocation12]  }
  0x39   :  { %v81_v2 = vand.u32 127, %v80_v1  ;;  %s162_s14 = sld [smem:[#allocation7 + $0x81]]  ;;  %s148_s26 = sshll.u32 %s283_s25, 4  ;;  %s149_s26 = int_to_ptr.vmem [resolvable:$true] %s148_s26 }
  0x3a   :  { %s90_s15 = sld [smem:[#allocation7]]  ;;  %s246_s27 = scalar_lea.vmem %s149_s26, 128 }
  0x3b   :  { %s161_s16 = sld [smem:[#allocation7 + $0x80]]  ;;  %v82_v3 = vand.u32 1, %v81_v2  ;;  %p247_p6 = scmp.ne.s32.totalorder %s149_s26, %s246_s27 }
  0x3c   :  { %86 = vrot.lane.b32.xlu0 %v79_v0, %s282_s12  ;;  %s97_s17 = sld [smem:[#allocation8]]  ;;  %p251_p7 = scmp.lt.s32.totalorder %s149_s26, %s149_s26 }
  0x3d   :  { %s163_s18 = sld [smem:[#allocation8 + $0x1]]  ;;  %vm329_vm0 = vcmp.eq.s32.totalorder %v82_v3, 0  ;;  %p252_p8 = scmp.lt.s32.totalorder %s246_s27, %s246_s27 }
  0x3e   :  { %v94_v6 = vstv %s160_s13  ;;  %s118_s19 = sld [smem:[#allocation9]] }
  0x3f   :  { %v108_v7 = vstv %s162_s14  ;;  %s164_s20 = sld [smem:[#allocation9 + $0x80]]  ;;  %p253_p9 = por %p252_p8, %p251_p7 }
  0x40   :  { %v91_v9 = vstv %s90_s15  ;;  %s165_s21 = sld [smem:[#allocation9 + $0x1]] }
  0x41   :  { %v105_v10 = vstv %s161_s16  ;;  %s166_s22 = sld [smem:[#allocation9 + $0x81]]  ;;  %p254_p10 = pnand %p253_p9, %p247_p6 }
  0x42   :  { %v98_v17 = vstv %s97_s17  ;;  %s128_s23 = sld [smem:[#allocation11]] }
  0x43   :  { %v112_v18 = vstv %s163_s18  ;;  %s167_s24 = sld [smem:[#allocation11 + $0x1]] }
  0x44   :  { %v120_v25 = vstv %s118_s19 }
  0x45   :  { %v121_v26 = vstv %s164_s20 }
  0x46   :  { %v125_v28 = vstv %s165_s21  ;;  %v122_v33 = vsel %vm329_vm0, %v120_v25, %v121_v26 }
  0x47   :  { %v126_v29 = vstv %s166_s22 }
  0x48   :  { %v127_v35 = vsel %vm329_vm0, %v125_v28, %v126_v29  ;;  %v130_v37 = vstv %s128_s23 }
  0x49   :  { %v131_v38 = vstv %s167_s24 }
  0x4a   :  { %v132_v41 = vsel %vm329_vm0, %v130_v37, %v131_v38 }
  0xaa   :  { %v85_v5 = vpop.permute.xlu0 %84 }
  0xab   :  { %v89_v8 = vsel %vm329_vm0, %v85_v5, %v79_v0 }
  0xac   :  { %v95_v13 = vmul.f32 %v94_v6, %v89_v8  ;;  %v109_v14 = vmul.f32 %v108_v7, %v89_v8 }
  0xae   :  { %v87_v11 = vpop.permute.xlu0 %86 }
  0xaf   :  { %v88_v12 = vsel %vm329_vm0, %v79_v0, %v87_v11 }
  0xb0   :  { %v92_v15 = vmul.f32 %v91_v9, %v88_v12  ;;  %v106_v16 = vmul.f32 %v105_v10, %v88_v12 }
  0xb2   :  { %v96_v19 = vadd.f32 %v95_v13, %v92_v15  ;;  %v110_v20 = vadd.f32 %v109_v14, %v106_v16 }
  0xb4   :  { %v99_v21 = vadd.f32 %v98_v17, %v96_v19  ;;  %v113_v22 = vadd.f32 %v112_v18, %v110_v20 }
  0xb6   :  { %v100_v23 = vmul.f32 0.5, %v99_v21  ;;  %v114_v24 = vmul.f32 0.5, %v113_v22 }
  0xb8   :  { %176 = vtanh.f32 %v100_v23 }
  0xb9   :  { %178 = vtanh.f32 %v114_v24 }
  0xc5   :  { %v177_v27 = vpop.eup %176 }
  0xc6   :  { %v179_v30 = vpop.eup %178  ;;  %v102_v31 = vmul.f32 0.5, %v177_v27 }
  0xc7   :  { %v116_v32 = vmul.f32 0.5, %v179_v30 }
  0xc8   :  { %v103_v34 = vadd.f32 0.5, %v102_v31 }
  0xc9   :  { %v117_v36 = vadd.f32 0.5, %v116_v32 }
  0xca   :  { %v133_v39 = vmul.f32 %v122_v33, %v103_v34 }
  0xcb   :  { %v134_v40 = vmul.f32 %v127_v35, %v117_v36 }
  0xcd   :  { %v135_v42 = vadd.f32 %v134_v40, %v133_v39 }
  0xcf   :  { %v136_v43 = vadd.f32 %v135_v42, %v132_v41 }
  0xd1   :  { %v137_v44 = vmul.f32 0.5, %v136_v43 }
  0xd3   :  { %180 = vtanh.f32 %v137_v44 }
  0xe0   :  { %v181_v45 = vpop.eup %180 }
  0xe1   :  { %v139_v46 = vmul.f32 0.5, %v181_v45 }
  0xe3   :  { %v140_v47 = vadd.f32 0.5, %v139_v46 }
  0xe5   :  { %141 = vst [vmem:[#allocation12] sm:$0xff] %v140_v47 }
  0xe6   :  { %257 = shalt.err (!%p254_p10)
}
  0xe7   :  { %151 = dma.vmem_to_hbm [thread:$0]  %s149_s26, 128, %s351_s5, [#allocation4]  }
  0xe8   :  { %274 = dma.done.wait [#allocation4], 128  }
  0xe9   :  { %275 = vsyncadd [#allocation4], 4294967168 }
  0xea   :  { %155 = vsyncpa [#allocation3], 1 }
  0xeb   :  { %156 = vsyncpa [#allocation4], 1 }
  0xec   :  { %157 = vsyncpa [#allocation5], 1 }
  0xed   :  { %158 = vsyncpa [#allocation6], 1 }
  0xee   :  { %159 = vsyncpa [#allocation10], 1 }

</bundles_post_ra>
